<compile_context>
chip_gen: v6e
topology: v6e:2x2x1
jax: 0.10.0
libtpu: 0.0.40
codegen_flags: <defaults>
</compile_context>

<pallas_src>
import functools
import math

import jax
import jax.numpy as jnp
import numpy as np
from jax.experimental import pallas as pl
from jax.experimental.pallas import tpu as pltpu

NUM_HEADS = 8
HIDDEN_DIM = 64
HEAD_DIM = HIDDEN_DIM // NUM_HEADS
LN_EPS = 1e-5

# MXU operand dtype: bf16 operands + f32 accumulation is the full-rate path on
# v5e/v6e/v7x.  Set to jnp.float32 for bit-tight parity with an f32 reference.
MATMUL_DTYPE = jnp.bfloat16

# Row order of the packed (4D, D) weight slab and the packed (10, D) vector slab.
_W_ORDER = ("wq", "wo", "w1", "w2")
_B_ORDER = ("bq", "bk", "bv", "bo", "g1", "be1", "b1", "b2", "g2", "be2")


def _layernorm(x, gamma, beta):
    # x: (rows, D); gamma/beta: (1, D). Biased variance (PyTorch LayerNorm).
    mean = jnp.mean(x, axis=-1, keepdims=True)
    var = jnp.mean((x - mean) ** 2, axis=-1, keepdims=True)
    return (x - mean) * jax.lax.rsqrt(var + LN_EPS) * gamma + beta


def _make_kernel(bt, seq, need_weights, has_prev):
    """Build the kernel for a (bt, seq, HIDDEN_DIM) batch tile."""
    H, Hd, D = NUM_HEADS, HEAD_DIM, HIDDEN_DIM
    N = bt * seq          # flattened rows in this batch tile
    HS = H * seq          # head-stacked rows per batch element
    scale = 1.0 / math.sqrt(Hd)
    f32 = jnp.float32

    def kernel(*refs):
        it = iter(refs)
        q_ref = next(it)
        k_ref = next(it)
        prev_ref = next(it) if has_prev else None
        w_ref = next(it)        # (4D, D)   : wq, wo, w1, w2 (row-packed)
        wkv_ref = next(it)      # (D, 2D)   : [wk | wv] (lane-packed)
        b_ref = next(it)        # (10, D)   : biases / LayerNorm vectors
        mask_ref = next(it)     # (HS, D)   : grid-invariant head mask
        out_ref = next(it)
        attn_ref = next(it) if need_weights else None

        c = lambda x: x.astype(MATMUL_DTYPE)

        def mm(a, b):                       # 2D matmul, f32 accumulation
            return jnp.dot(c(a), c(b), preferred_element_type=f32)

        def bmm(spec, a, b):                # batched matmul, f32 accumulation
            return jnp.einsum(spec, c(a), c(b), preferred_element_type=f32)

        def W(i):                           # i-th packed (D, D) weight
            return w_ref[i * D:(i + 1) * D, :]

        def V(i):                           # i-th packed (1, D) bias / LN vector
            return b_ref[i:i + 1, :]

        q = q_ref[...]                      # (N, D)
        k = k_ref[...]

        # ---- projections: Q alone, K|V fused into one lane-dense matmul ----
        qp = mm(q, W(0)) + V(0)             # (N, D)
        kv = mm(k, wkv_ref[...])            # (N, 2D), N=128-lane dense result
        kp = kv[:, :D] + V(1)               # (N, D)
        vp = kv[:, D:] + V(2)               # (N, D)

        # Leading-dim split only (seq % 8 == 0 -> layout preserving).
        qp3 = qp.reshape(bt, seq, D)
        kp3 = kp.reshape(bt, seq, D)
        vp3 = vp.reshape(bt, seq, D)

        # ---- all heads at once via a head-stacked row axis of length H*seq ----
        # Stacked row n corresponds to (head = n // seq, query = n % seq).
        head_mask = mask_ref[...][None, :, :]                        # (1, HS, D)
        q_rep = jnp.concatenate([qp3] * H, axis=1) * head_mask       # (bt, HS, D)

        # Per-head scaled dot-product scores + softmax over keys (exact divide).
        s = bmm("bnd,bjd->bnj", q_rep, kp3) * scale                  # (bt, HS, S)
        s = s - jnp.max(s, axis=-1, keepdims=True)
        e = jnp.exp(s)
        p = e / jnp.sum(e, axis=-1, keepdims=True)

        # Per-head context; the head fold is 7 VPU adds over sublane slices.
        ctx_all = bmm("bnj,bjd->bnd", p, vp3) * head_mask            # (bt, HS, D)
        ctx = ctx_all[:, 0:seq, :]
        for h in range(1, H):
            ctx = ctx + ctx_all[:, h * seq:(h + 1) * seq, :]         # (bt, S, D)
        ctx2 = ctx.reshape(N, D)

        # ---- output projection, residual, LayerNorm, FFN, residual, LayerNorm ----
        mha = mm(ctx2, W(1)) + V(3)
        if has_prev:
            added = mha + prev_ref[...]
        else:
            added = mha
        norm1 = _layernorm(added, V(4), V(5))
        hid = jnp.maximum(mm(norm1, W(2)) + V(6), 0.0)
        ff = mm(hid, W(3)) + V(7)
        norm2 = _layernorm(ff + norm1, V(8), V(9))
        out_ref[...] = norm2.astype(out_ref.dtype)

        if need_weights:
            # Head-averaged attention weights (PyTorch need_weights=True default):
            # another 7 VPU adds over sublane slices instead of an MXU matmul.
            acc = p[:, 0:seq, :]
            for h in range(1, H):
                acc = acc + p[:, h * seq:(h + 1) * seq, :]
            attn_ref[...] = (acc * (1.0 / H)).astype(attn_ref.dtype)

    return kernel


def _vmem_estimate_bytes(bt, seq, need_weights, has_prev):
    """Rough VMEM footprint of one grid step (pipelined I/O + big temporaries)."""
    D, H = HIDDEN_DIM, NUM_HEADS
    rows, hs = bt * seq, NUM_HEADS * seq
    f32 = 4
    io = (2 + int(has_prev)) * rows * D * f32 * 2          # double-buffered inputs
    io += rows * D * f32 * 2                               # main output
    if need_weights:
        io += bt * seq * seq * f32 * 2                     # attn-weights output
    tmp = 4 * bt * hs * seq * f32                          # scores / exp / probs (+cast)
    tmp += 4 * bt * hs * D * f32                           # q_rep / ctx_all (+cast)
    tmp += 10 * rows * D * f32                             # projections / FFN temps
    par = (4 * D * D + 2 * D * D + len(_B_ORDER) * D + hs * D) * f32 * 2
    return io + tmp + par


def _pick_block_b(B, seq, need_weights, has_prev, budget_bytes=12 * 1024 * 1024):
    # Cap at B // 2 so the grid has >= 2 (parallel) steps — keeps v7x's second
    # TensorCore busy — and size the tile against a conservative VMEM budget
    # (well inside the 16/32 MiB scoped defaults on v5e / v6e / v7x).
    cap = max(B // 2, 1)
    best = 1
    for d in range(1, cap + 1):
        if B % d == 0 and _vmem_estimate_bytes(d, seq, need_weights, has_prev) <= budget_bytes:
            best = d
    return best


@functools.partial(jax.jit, static_argnames=("need_weights", "block_b"))
def guided_attention(q, k, prev, params, *, need_weights=True, block_b=None):
    B, S, D = q.shape
    H = NUM_HEADS
    assert D == HIDDEN_DIM, "hidden_dim is fixed at 64 (module default)"
    assert S % 8 == 0, "sequence length must be a multiple of 8 (sublane tile)"
    has_prev = prev is not None

    if block_b is None:
        block_b = _pick_block_b(B, S, need_weights, has_prev)
    assert B % block_b == 0
    nb = B // block_b
    N = block_b * S

    # Batch-major 2D views so projections / FFN / LayerNorm are big row slabs.
    q2 = q.reshape(B * S, D)
    k2 = k.reshape(B * S, D)

    # Packed parameter slabs -> few DMA channels, zero-cost static slices inside.
    w_slab = jnp.concatenate([params[n] for n in _W_ORDER], axis=0)     # (4D, D)
    wkv_slab = jnp.concatenate([params["wk"], params["wv"]], axis=1)    # (D, 2D)
    b_slab = jnp.concatenate([params[n] for n in _B_ORDER], axis=0)     # (10, D)

    # Grid-invariant head mask built on the host: no in-kernel iota / int-div.
    head_mask = jnp.asarray(
        (np.arange(H * S)[:, None] // S == np.arange(D)[None, :] // HEAD_DIM)
        .astype(np.float32))                                            # (HS, D)

    row_spec = pl.BlockSpec((N, D), lambda i: (i, 0))
    const = lambda i: (0, 0)

    in_specs = [row_spec, row_spec]
    operands = [q2, k2]
    if has_prev:
        in_specs.append(row_spec)
        operands.append(prev.reshape(B * S, D))
    in_specs += [
        pl.BlockSpec((len(_W_ORDER) * D, D), const),   # packed weights
        pl.BlockSpec((D, 2 * D), const),               # fused K|V weights
        pl.BlockSpec((len(_B_ORDER), D), const),       # packed biases / LN vectors
        pl.BlockSpec((H * S, D), const),               # head mask (VMEM resident)
    ]
    operands += [w_slab, wkv_slab, b_slab, head_mask]

    out_specs = [pl.BlockSpec((N, D), lambda i: (i, 0))]
    out_shape = [jax.ShapeDtypeStruct((B * S, D), q.dtype)]
    if need_weights:
        out_specs.append(pl.BlockSpec((block_b, S, S), lambda i: (i, 0, 0)))
        out_shape.append(jax.ShapeDtypeStruct((B, S, S), q.dtype))

    results = pl.pallas_call(
        _make_kernel(block_b, S, need_weights, has_prev),
        out_shape=tuple(out_shape),
        grid_spec=pltpu.PrefetchScalarGridSpec(
            num_scalar_prefetch=0,
            grid=(nb,),
            in_specs=in_specs,
            out_specs=tuple(out_specs),
        ),
        compiler_params=pltpu.CompilerParams(
            dimension_semantics=("parallel",),
            vmem_limit_bytes=32 * 1024 * 1024,
        ),
    )(*operands)

    out = results[0].reshape(B, S, D)
    attn = results[1] if need_weights else None
    return out, attn


def ref_forward(q, k, prev, p):
    """Pure-JAX reference mirroring torch.nn.MultiheadAttention semantics."""
    B, S, D = q.shape
    qp = q @ p["wq"] + p["bq"]
    kp = k @ p["wk"] + p["bk"]
    vp = k @ p["wv"] + p["bv"]

    def split(x):
        return x.reshape(B, S, NUM_HEADS, HEAD_DIM).transpose(0, 2, 1, 3)

    qh, kh, vh = split(qp), split(kp), split(vp)
    scores = jnp.einsum("bhqd,bhkd->bhqk", qh, kh) / math.sqrt(HEAD_DIM)
    probs = jax.nn.softmax(scores, axis=-1)
    ctx = jnp.einsum("bhqk,bhkd->bhqd", probs, vh)
    ctx = ctx.transpose(0, 2, 1, 3).reshape(B, S, D)
    mha_out = ctx @ p["wo"] + p["bo"]
    attn_wts = probs.mean(axis=1)

    def ln(x, g, b):
        m = x.mean(-1, keepdims=True)
        v = ((x - m) ** 2).mean(-1, keepdims=True)
        return (x - m) / jnp.sqrt(v + LN_EPS) * g + b

    added = mha_out + prev if prev is not None else mha_out
    n1 = ln(added, p["g1"], p["be1"])
    ff = jnp.maximum(n1 @ p["w1"] + p["b1"], 0.0) @ p["w2"] + p["b2"]
    n2 = ln(ff + n1, p["g2"], p["be2"])
    return n2, attn_wts


def init_params(key):
    ks = jax.random.split(key, 16)
    D = HIDDEN_DIM

    def w(kk, shape, scale):
        return (jax.random.normal(kk, shape) * scale).astype(jnp.float32)

    s = 1.0 / math.sqrt(D)
    return {
        "wq": w(ks[0], (D, D), s), "wk": w(ks[1], (D, D), s), "wv": w(ks[2], (D, D), s),
        "bq": w(ks[3], (1, D), 0.02), "bk": w(ks[4], (1, D), 0.02), "bv": w(ks[5], (1, D), 0.02),
        "wo": w(ks[6], (D, D), s), "bo": w(ks[7], (1, D), 0.02),
        "g1": 1.0 + w(ks[8], (1, D), 0.02), "be1": w(ks[9], (1, D), 0.02),
        "w1": w(ks[10], (D, D), s), "b1": w(ks[11], (1, D), 0.02),
        "w2": w(ks[12], (D, D), s), "b2": w(ks[13], (1, D), 0.02),
        "g2": 1.0 + w(ks[14], (1, D), 0.02), "be2": w(ks[15], (1, D), 0.02),
    }


if __name__ == "__main__":
    key = jax.random.PRNGKey(0)
    key_p, key_q, key_k, key_prev = jax.random.split(key, 4)

    B, S, D = 2, 8, HIDDEN_DIM
    params = init_params(key_p)
    q = jax.random.normal(key_q, (B, S, D), jnp.float32)
    k = jax.random.normal(key_k, (B, S, D), jnp.float32)
    prev = jax.random.normal(key_prev, (B, S, D), jnp.float32)  # prev_ga_output

    # Tolerances cover the bf16 MXU operands (f32 accumulation).
    TOL = dict(rtol=5e-2, atol=5e-2)

    out, attn = guided_attention(q, k, prev, params)
    out = jax.block_until_ready(out)
    attn = jax.block_until_ready(attn)
    ref_out, ref_attn = ref_forward(q, k, prev, params)
    np.testing.assert_allclose(np.asarray(out), np.asarray(ref_out), **TOL)
    np.testing.assert_allclose(np.asarray(attn), np.asarray(ref_attn), **TOL)
    assert out.shape == (B, S, D) and attn.shape == (B, S, S)

    # prev_ga_output=None + need_weights=False fast path: the prev operand is
    # never DMA'd and no attention weights are computed or written back.
    out_nw, attn_nw = guided_attention(q, k, None, params, need_weights=False)
    out_nw = jax.block_until_ready(out_nw)
    assert attn_nw is None
    ref_out_np, _ = ref_forward(q, k, None, params)
    np.testing.assert_allclose(np.asarray(out_nw), np.asarray(ref_out_np), **TOL)

    # Slightly larger shape: exercises block_b=B//2 (nb=2 parallel grid steps).
    B2, S2 = 4, 16
    q2 = jax.random.normal(jax.random.PRNGKey(1), (B2, S2, D), jnp.float32)
    k2 = jax.random.normal(jax.random.PRNGKey(2), (B2, S2, D), jnp.float32)
    p2 = jax.random.normal(jax.random.PRNGKey(3), (B2, S2, D), jnp.float32)
    out2, attn2 = guided_attention(q2, k2, p2, params)
    out2 = jax.block_until_ready(out2)
    ref2, refa2 = ref_forward(q2, k2, p2, params)
    np.testing.assert_allclose(np.asarray(out2), np.asarray(ref2), **TOL)
    np.testing.assert_allclose(np.asarray(attn2), np.asarray(refa2), **TOL)

    print("KERNEL_OK")
</pallas_src>

<mosaic_0001>
module attributes {stable_mosaic.version = 11 : i64} {
  func.func @kernel(%arg0: i32, %arg1: memref<8x64xf32, #tpu.memory_space<vmem>>, %arg2: memref<8x64xf32, #tpu.memory_space<vmem>>, %arg3: memref<8x64xf32, #tpu.memory_space<vmem>>, %arg4: memref<256x64xf32, #tpu.memory_space<vmem>>, %arg5: memref<64x128xf32, #tpu.memory_space<vmem>>, %arg6: memref<10x64xf32, #tpu.memory_space<vmem>>, %arg7: memref<64x64xf32, #tpu.memory_space<vmem>>, %arg8: memref<8x64xf32, #tpu.memory_space<vmem>>, %arg9: memref<1x8x8xf32, #tpu.memory_space<vmem>>) attributes {dimension_semantics = [#tpu.dimension_semantics<parallel>], iteration_bounds = array<i64: 2>, scalar_prefetch = 0 : i64, scratch_operands = 0 : i64, tpu.core_type = #tpu.core_type<tc>, window_params = [{transform_indices = @transform_0, window_bounds = array<i64: 8, 64>}, {transform_indices = @transform_1, window_bounds = array<i64: 8, 64>}, {transform_indices = @transform_2, window_bounds = array<i64: 8, 64>}, {pipeline_mode = #tpu.pipeline_mode<synchronous>, transform_indices = @transform_3, window_bounds = array<i64: 256, 64>}, {pipeline_mode = #tpu.pipeline_mode<synchronous>, transform_indices = @transform_4, window_bounds = array<i64: 64, 128>}, {pipeline_mode = #tpu.pipeline_mode<synchronous>, transform_indices = @transform_5, window_bounds = array<i64: 10, 64>}, {pipeline_mode = #tpu.pipeline_mode<synchronous>, transform_indices = @transform_6, window_bounds = array<i64: 64, 64>}, {transform_indices = @transform_7, window_bounds = array<i64: 8, 64>}, {transform_indices = @transform_8, window_bounds = array<i64: 1, 8, 8>}]} {
    %c0 = arith.constant 0 : index
    %c0_0 = arith.constant 0 : index
    %0 = vector.load %arg1[%c0, %c0_0] : memref<8x64xf32, #tpu.memory_space<vmem>>, vector<8x64xf32>
    %c0_1 = arith.constant 0 : index
    %c0_2 = arith.constant 0 : index
    %1 = vector.load %arg2[%c0_1, %c0_2] : memref<8x64xf32, #tpu.memory_space<vmem>>, vector<8x64xf32>
    %c0_3 = arith.constant 0 : index
    %c0_4 = arith.constant 0 : index
    %2 = vector.load %arg4[%c0_3, %c0_4] : memref<256x64xf32, #tpu.memory_space<vmem>>, vector<64x64xf32>
    %3 = arith.truncf %0 : vector<8x64xf32> to vector<8x64xbf16>
    %4 = arith.truncf %2 : vector<64x64xf32> to vector<64x64xbf16>
    %cst = arith.constant dense<0.000000e+00> : vector<8x64xf32>
    %5 = tpu.matmul %3, %4, %cst {dimension_numbers = #tpu.dot_dimension_numbers<[1], [0], [0], [1], [0, 0, 1, 1], [], []>} : vector<8x64xbf16>, vector<64x64xbf16>, vector<8x64xf32> -> vector<8x64xf32>
    %c0_5 = arith.constant 0 : index
    %c0_6 = arith.constant 0 : index
    %6 = vector.load %arg6[%c0_5, %c0_6] : memref<10x64xf32, #tpu.memory_space<vmem>>, vector<1x64xf32>
    %7 = vector.broadcast %6 : vector<1x64xf32> to vector<8x64xf32>
    %8 = arith.addf %5, %7 : vector<8x64xf32>
    %c0_7 = arith.constant 0 : index
    %c0_8 = arith.constant 0 : index
    %9 = vector.load %arg5[%c0_7, %c0_8] : memref<64x128xf32, #tpu.memory_space<vmem>>, vector<64x128xf32>
    %10 = arith.truncf %1 : vector<8x64xf32> to vector<8x64xbf16>
    %11 = arith.truncf %9 : vector<64x128xf32> to vector<64x128xbf16>
    %cst_9 = arith.constant dense<0.000000e+00> : vector<8x128xf32>
    %12 = tpu.matmul %10, %11, %cst_9 {dimension_numbers = #tpu.dot_dimension_numbers<[1], [0], [0], [1], [0, 0, 1, 1], [], []>} : vector<8x64xbf16>, vector<64x128xbf16>, vector<8x128xf32> -> vector<8x128xf32>
    %13 = vector.extract_strided_slice %12 {offsets = [0, 0], sizes = [8, 64], strides = [1, 1]} : vector<8x128xf32> to vector<8x64xf32>
    %c1 = arith.constant 1 : index
    %c0_10 = arith.constant 0 : index
    %14 = vector.load %arg6[%c1, %c0_10] : memref<10x64xf32, #tpu.memory_space<vmem>>, vector<1x64xf32>
    %15 = vector.broadcast %14 : vector<1x64xf32> to vector<8x64xf32>
    %16 = arith.addf %13, %15 : vector<8x64xf32>
    %17 = vector.extract_strided_slice %12 {offsets = [0, 64], sizes = [8, 64], strides = [1, 1]} : vector<8x128xf32> to vector<8x64xf32>
    %c2 = arith.constant 2 : index
    %c0_11 = arith.constant 0 : index
    %18 = vector.load %arg6[%c2, %c0_11] : memref<10x64xf32, #tpu.memory_space<vmem>>, vector<1x64xf32>
    %19 = vector.broadcast %18 : vector<1x64xf32> to vector<8x64xf32>
    %20 = arith.addf %17, %19 : vector<8x64xf32>
    %21 = vector.shape_cast %8 : vector<8x64xf32> to vector<1x8x64xf32>
    %22 = vector.shape_cast %16 : vector<8x64xf32> to vector<1x8x64xf32>
    %23 = vector.shape_cast %20 : vector<8x64xf32> to vector<1x8x64xf32>
    %c0_12 = arith.constant 0 : index
    %c0_13 = arith.constant 0 : index
    %24 = vector.load %arg7[%c0_12, %c0_13] : memref<64x64xf32, #tpu.memory_space<vmem>>, vector<64x64xf32>
    %25 = vector.shape_cast %24 : vector<64x64xf32> to vector<1x64x64xf32>
    %26 = tpu.concatenate %21, %21, %21, %21, %21, %21, %21, %21 in 1 : vector<1x8x64xf32>, vector<1x8x64xf32>, vector<1x8x64xf32>, vector<1x8x64xf32>, vector<1x8x64xf32>, vector<1x8x64xf32>, vector<1x8x64xf32>, vector<1x8x64xf32> -> vector<1x64x64xf32>
    %27 = arith.mulf %26, %25 : vector<1x64x64xf32>
    %28 = arith.truncf %27 : vector<1x64x64xf32> to vector<1x64x64xbf16>
    %29 = arith.truncf %22 : vector<1x8x64xf32> to vector<1x8x64xbf16>
    "tpu.trace_start"() <{level = 10 : i32, message = "bnd,bjd->bnj"}> : () -> ()
    %cst_14 = arith.constant dense<0.000000e+00> : vector<1x64x8xf32>
    %30 = tpu.matmul %28, %29, %cst_14 {dimension_numbers = #tpu.dot_dimension_numbers<[2], [2], [1], [1], [0, 0, 0, 1, 1, 1], [0], [0]>} : vector<1x64x64xbf16>, vector<1x8x64xbf16>, vector<1x64x8xf32> -> vector<1x64x8xf32>
    "tpu.trace_stop"() : () -> ()
    %cst_15 = arith.constant 0.353553385 : f32
    %31 = vector.broadcast %cst_15 : f32 to vector<1x64x8xf32>
    %32 = arith.mulf %30, %31 : vector<1x64x8xf32>
    %cst_16 = arith.constant dense<0xFF800000> : vector<1x64xf32>
    %33 = vector.multi_reduction <maximumf>, %32, %cst_16 [2] : vector<1x64x8xf32> to vector<1x64xf32>
    %34 = vector.shape_cast %33 : vector<1x64xf32> to vector<1x64x1xf32>
    %35 = vector.broadcast %34 : vector<1x64x1xf32> to vector<1x64x8xf32>
    %36 = arith.subf %32, %35 : vector<1x64x8xf32>
    %37 = math.exp %36 : vector<1x64x8xf32>
    %cst_17 = arith.constant dense<0.000000e+00> : vector<1x64xf32>
    %38 = vector.multi_reduction <add>, %37, %cst_17 [2] : vector<1x64x8xf32> to vector<1x64xf32>
    %39 = vector.shape_cast %38 : vector<1x64xf32> to vector<1x64x1xf32>
    %40 = vector.broadcast %39 : vector<1x64x1xf32> to vector<1x64x8xf32>
    %41 = arith.divf %37, %40 : vector<1x64x8xf32>
    %42 = arith.truncf %41 : vector<1x64x8xf32> to vector<1x64x8xbf16>
    %43 = arith.truncf %23 : vector<1x8x64xf32> to vector<1x8x64xbf16>
    "tpu.trace_start"() <{level = 10 : i32, message = "bnj,bjd->bnd"}> : () -> ()
    %cst_18 = arith.constant dense<0.000000e+00> : vector<1x64x64xf32>
    %44 = tpu.matmul %42, %43, %cst_18 {dimension_numbers = #tpu.dot_dimension_numbers<[2], [1], [1], [2], [0, 0, 0, 1, 1, 2], [0], [0]>} : vector<1x64x8xbf16>, vector<1x8x64xbf16>, vector<1x64x64xf32> -> vector<1x64x64xf32>
    "tpu.trace_stop"() : () -> ()
    %45 = arith.mulf %44, %25 : vector<1x64x64xf32>
    %46 = vector.extract_strided_slice %45 {offsets = [0, 0, 0], sizes = [1, 8, 64], strides = [1, 1, 1]} : vector<1x64x64xf32> to vector<1x8x64xf32>
    %47 = vector.extract_strided_slice %45 {offsets = [0, 8, 0], sizes = [1, 8, 64], strides = [1, 1, 1]} : vector<1x64x64xf32> to vector<1x8x64xf32>
    %48 = arith.addf %46, %47 : vector<1x8x64xf32>
    %49 = vector.extract_strided_slice %45 {offsets = [0, 16, 0], sizes = [1, 8, 64], strides = [1, 1, 1]} : vector<1x64x64xf32> to vector<1x8x64xf32>
    %50 = arith.addf %48, %49 : vector<1x8x64xf32>
    %51 = vector.extract_strided_slice %45 {offsets = [0, 24, 0], sizes = [1, 8, 64], strides = [1, 1, 1]} : vector<1x64x64xf32> to vector<1x8x64xf32>
    %52 = arith.addf %50, %51 : vector<1x8x64xf32>
    %53 = vector.extract_strided_slice %45 {offsets = [0, 32, 0], sizes = [1, 8, 64], strides = [1, 1, 1]} : vector<1x64x64xf32> to vector<1x8x64xf32>
    %54 = arith.addf %52, %53 : vector<1x8x64xf32>
    %55 = vector.extract_strided_slice %45 {offsets = [0, 40, 0], sizes = [1, 8, 64], strides = [1, 1, 1]} : vector<1x64x64xf32> to vector<1x8x64xf32>
    %56 = arith.addf %54, %55 : vector<1x8x64xf32>
    %57 = vector.extract_strided_slice %45 {offsets = [0, 48, 0], sizes = [1, 8, 64], strides = [1, 1, 1]} : vector<1x64x64xf32> to vector<1x8x64xf32>
    %58 = arith.addf %56, %57 : vector<1x8x64xf32>
    %59 = vector.extract_strided_slice %45 {offsets = [0, 56, 0], sizes = [1, 8, 64], strides = [1, 1, 1]} : vector<1x64x64xf32> to vector<1x8x64xf32>
    %60 = arith.addf %58, %59 : vector<1x8x64xf32>
    %61 = vector.shape_cast %60 : vector<1x8x64xf32> to vector<8x64xf32>
    %c64 = arith.constant 64 : index
    %c0_19 = arith.constant 0 : index
    %62 = vector.load %arg4[%c64, %c0_19] : memref<256x64xf32, #tpu.memory_space<vmem>>, vector<64x64xf32>
    %63 = arith.truncf %61 : vector<8x64xf32> to vector<8x64xbf16>
    %64 = arith.truncf %62 : vector<64x64xf32> to vector<64x64xbf16>
    %cst_20 = arith.constant dense<0.000000e+00> : vector<8x64xf32>
    %65 = tpu.matmul %63, %64, %cst_20 {dimension_numbers = #tpu.dot_dimension_numbers<[1], [0], [0], [1], [0, 0, 1, 1], [], []>} : vector<8x64xbf16>, vector<64x64xbf16>, vector<8x64xf32> -> vector<8x64xf32>
    %c3 = arith.constant 3 : index
    %c0_21 = arith.constant 0 : index
    %66 = vector.load %arg6[%c3, %c0_21] : memref<10x64xf32, #tpu.memory_space<vmem>>, vector<1x64xf32>
    %67 = vector.broadcast %66 : vector<1x64xf32> to vector<8x64xf32>
    %68 = arith.addf %65, %67 : vector<8x64xf32>
    %c0_22 = arith.constant 0 : index
    %c0_23 = arith.constant 0 : index
    %69 = vector.load %arg3[%c0_22, %c0_23] : memref<8x64xf32, #tpu.memory_space<vmem>>, vector<8x64xf32>
    %70 = arith.addf %68, %69 : vector<8x64xf32>
    %c4 = arith.constant 4 : index
    %c0_24 = arith.constant 0 : index
    %71 = vector.load %arg6[%c4, %c0_24] : memref<10x64xf32, #tpu.memory_space<vmem>>, vector<1x64xf32>
    %c5 = arith.constant 5 : index
    %c0_25 = arith.constant 0 : index
    %72 = vector.load %arg6[%c5, %c0_25] : memref<10x64xf32, #tpu.memory_space<vmem>>, vector<1x64xf32>
    %cst_26 = arith.constant dense<0.000000e+00> : vector<8xf32>
    %73 = vector.multi_reduction <add>, %70, %cst_26 [1] : vector<8x64xf32> to vector<8xf32>
    %74 = vector.shape_cast %73 : vector<8xf32> to vector<8x1xf32>
    %cst_27 = arith.constant 6.400000e+01 : f32
    %75 = vector.broadcast %cst_27 : f32 to vector<8x1xf32>
    %76 = arith.divf %74, %75 : vector<8x1xf32>
    %77 = vector.broadcast %76 : vector<8x1xf32> to vector<8x64xf32>
    %78 = arith.subf %70, %77 : vector<8x64xf32>
    %79 = arith.mulf %78, %78 : vector<8x64xf32>
    %cst_28 = arith.constant dense<0.000000e+00> : vector<8xf32>
    %80 = vector.multi_reduction <add>, %79, %cst_28 [1] : vector<8x64xf32> to vector<8xf32>
    %81 = vector.shape_cast %80 : vector<8xf32> to vector<8x1xf32>
    %cst_29 = arith.constant 6.400000e+01 : f32
    %82 = vector.broadcast %cst_29 : f32 to vector<8x1xf32>
    %83 = arith.divf %81, %82 : vector<8x1xf32>
    %84 = vector.broadcast %76 : vector<8x1xf32> to vector<8x64xf32>
    %85 = arith.subf %70, %84 : vector<8x64xf32>
    %cst_30 = arith.constant 9.99999974E-6 : f32
    %86 = vector.broadcast %cst_30 : f32 to vector<8x1xf32>
    %87 = arith.addf %83, %86 : vector<8x1xf32>
    %88 = math.rsqrt %87 : vector<8x1xf32>
    %89 = vector.broadcast %88 : vector<8x1xf32> to vector<8x64xf32>
    %90 = arith.mulf %85, %89 : vector<8x64xf32>
    %91 = vector.broadcast %71 : vector<1x64xf32> to vector<8x64xf32>
    %92 = arith.mulf %90, %91 : vector<8x64xf32>
    %93 = vector.broadcast %72 : vector<1x64xf32> to vector<8x64xf32>
    %94 = arith.addf %92, %93 : vector<8x64xf32>
    %c128 = arith.constant 128 : index
    %c0_31 = arith.constant 0 : index
    %95 = vector.load %arg4[%c128, %c0_31] : memref<256x64xf32, #tpu.memory_space<vmem>>, vector<64x64xf32>
    %96 = arith.truncf %94 : vector<8x64xf32> to vector<8x64xbf16>
    %97 = arith.truncf %95 : vector<64x64xf32> to vector<64x64xbf16>
    %cst_32 = arith.constant dense<0.000000e+00> : vector<8x64xf32>
    %98 = tpu.matmul %96, %97, %cst_32 {dimension_numbers = #tpu.dot_dimension_numbers<[1], [0], [0], [1], [0, 0, 1, 1], [], []>} : vector<8x64xbf16>, vector<64x64xbf16>, vector<8x64xf32> -> vector<8x64xf32>
    %c6 = arith.constant 6 : index
    %c0_33 = arith.constant 0 : index
    %99 = vector.load %arg6[%c6, %c0_33] : memref<10x64xf32, #tpu.memory_space<vmem>>, vector<1x64xf32>
    %100 = vector.broadcast %99 : vector<1x64xf32> to vector<8x64xf32>
    %101 = arith.addf %98, %100 : vector<8x64xf32>
    %cst_34 = arith.constant 0.000000e+00 : f32
    %102 = vector.broadcast %cst_34 : f32 to vector<8x64xf32>
    %103 = arith.maximumf %101, %102 : vector<8x64xf32>
    %c192 = arith.constant 192 : index
    %c0_35 = arith.constant 0 : index
    %104 = vector.load %arg4[%c192, %c0_35] : memref<256x64xf32, #tpu.memory_space<vmem>>, vector<64x64xf32>
    %105 = arith.truncf %103 : vector<8x64xf32> to vector<8x64xbf16>
    %106 = arith.truncf %104 : vector<64x64xf32> to vector<64x64xbf16>
    %cst_36 = arith.constant dense<0.000000e+00> : vector<8x64xf32>
    %107 = tpu.matmul %105, %106, %cst_36 {dimension_numbers = #tpu.dot_dimension_numbers<[1], [0], [0], [1], [0, 0, 1, 1], [], []>} : vector<8x64xbf16>, vector<64x64xbf16>, vector<8x64xf32> -> vector<8x64xf32>
    %c7 = arith.constant 7 : index
    %c0_37 = arith.constant 0 : index
    %108 = vector.load %arg6[%c7, %c0_37] : memref<10x64xf32, #tpu.memory_space<vmem>>, vector<1x64xf32>
    %109 = vector.broadcast %108 : vector<1x64xf32> to vector<8x64xf32>
    %110 = arith.addf %107, %109 : vector<8x64xf32>
    %111 = arith.addf %110, %94 : vector<8x64xf32>
    %c8 = arith.constant 8 : index
    %c0_38 = arith.constant 0 : index
    %112 = vector.load %arg6[%c8, %c0_38] : memref<10x64xf32, #tpu.memory_space<vmem>>, vector<1x64xf32>
    %c9 = arith.constant 9 : index
    %c0_39 = arith.constant 0 : index
    %113 = vector.load %arg6[%c9, %c0_39] : memref<10x64xf32, #tpu.memory_space<vmem>>, vector<1x64xf32>
    %cst_40 = arith.constant dense<0.000000e+00> : vector<8xf32>
    %114 = vector.multi_reduction <add>, %111, %cst_40 [1] : vector<8x64xf32> to vector<8xf32>
    %115 = vector.shape_cast %114 : vector<8xf32> to vector<8x1xf32>
    %cst_41 = arith.constant 6.400000e+01 : f32
    %116 = vector.broadcast %cst_41 : f32 to vector<8x1xf32>
    %117 = arith.divf %115, %116 : vector<8x1xf32>
    %118 = vector.broadcast %117 : vector<8x1xf32> to vector<8x64xf32>
    %119 = arith.subf %111, %118 : vector<8x64xf32>
    %120 = arith.mulf %119, %119 : vector<8x64xf32>
    %cst_42 = arith.constant dense<0.000000e+00> : vector<8xf32>
    %121 = vector.multi_reduction <add>, %120, %cst_42 [1] : vector<8x64xf32> to vector<8xf32>
    %122 = vector.shape_cast %121 : vector<8xf32> to vector<8x1xf32>
    %cst_43 = arith.constant 6.400000e+01 : f32
    %123 = vector.broadcast %cst_43 : f32 to vector<8x1xf32>
    %124 = arith.divf %122, %123 : vector<8x1xf32>
    %125 = vector.broadcast %117 : vector<8x1xf32> to vector<8x64xf32>
    %126 = arith.subf %111, %125 : vector<8x64xf32>
    %cst_44 = arith.constant 9.99999974E-6 : f32
    %127 = vector.broadcast %cst_44 : f32 to vector<8x1xf32>
    %128 = arith.addf %124, %127 : vector<8x1xf32>
    %129 = math.rsqrt %128 : vector<8x1xf32>
    %130 = vector.broadcast %129 : vector<8x1xf32> to vector<8x64xf32>
    %131 = arith.mulf %126, %130 : vector<8x64xf32>
    %132 = vector.broadcast %112 : vector<1x64xf32> to vector<8x64xf32>
    %133 = arith.mulf %131, %132 : vector<8x64xf32>
    %134 = vector.broadcast %113 : vector<1x64xf32> to vector<8x64xf32>
    %135 = arith.addf %133, %134 : vector<8x64xf32>
    %c0_45 = arith.constant 0 : index
    %c0_46 = arith.constant 0 : index
    %136 = vector.load %arg8[%c0_45, %c0_46] : memref<8x64xf32, #tpu.memory_space<vmem>>, vector<8x64xf32>
    tpu.vector_store %arg8[%c0_45, %c0_46], %135 {strides = array<i32>} : memref<8x64xf32, #tpu.memory_space<vmem>>, vector<8x64xf32>,
    %137 = vector.extract_strided_slice %41 {offsets = [0, 0, 0], sizes = [1, 8, 8], strides = [1, 1, 1]} : vector<1x64x8xf32> to vector<1x8x8xf32>
    %138 = vector.extract_strided_slice %41 {offsets = [0, 8, 0], sizes = [1, 8, 8], strides = [1, 1, 1]} : vector<1x64x8xf32> to vector<1x8x8xf32>
    %139 = arith.addf %137, %138 : vector<1x8x8xf32>
    %140 = vector.extract_strided_slice %41 {offsets = [0, 16, 0], sizes = [1, 8, 8], strides = [1, 1, 1]} : vector<1x64x8xf32> to vector<1x8x8xf32>
    %141 = arith.addf %139, %140 : vector<1x8x8xf32>
    %142 = vector.extract_strided_slice %41 {offsets = [0, 24, 0], sizes = [1, 8, 8], strides = [1, 1, 1]} : vector<1x64x8xf32> to vector<1x8x8xf32>
    %143 = arith.addf %141, %142 : vector<1x8x8xf32>
    %144 = vector.extract_strided_slice %41 {offsets = [0, 32, 0], sizes = [1, 8, 8], strides = [1, 1, 1]} : vector<1x64x8xf32> to vector<1x8x8xf32>
    %145 = arith.addf %143, %144 : vector<1x8x8xf32>
    %146 = vector.extract_strided_slice %41 {offsets = [0, 40, 0], sizes = [1, 8, 8], strides = [1, 1, 1]} : vector<1x64x8xf32> to vector<1x8x8xf32>
    %147 = arith.addf %145, %146 : vector<1x8x8xf32>
    %148 = vector.extract_strided_slice %41 {offsets = [0, 48, 0], sizes = [1, 8, 8], strides = [1, 1, 1]} : vector<1x64x8xf32> to vector<1x8x8xf32>
    %149 = arith.addf %147, %148 : vector<1x8x8xf32>
    %150 = vector.extract_strided_slice %41 {offsets = [0, 56, 0], sizes = [1, 8, 8], strides = [1, 1, 1]} : vector<1x64x8xf32> to vector<1x8x8xf32>
    %151 = arith.addf %149, %150 : vector<1x8x8xf32>
    %cst_47 = arith.constant 1.250000e-01 : f32
    %152 = vector.broadcast %cst_47 : f32 to vector<1x8x8xf32>
    %153 = arith.mulf %151, %152 : vector<1x8x8xf32>
    %c0_48 = arith.constant 0 : index
    %c0_49 = arith.constant 0 : index
    %c0_50 = arith.constant 0 : index
    %154 = vector.load %arg9[%c0_48, %c0_49, %c0_50] : memref<1x8x8xf32, #tpu.memory_space<vmem>>, vector<1x8x8xf32>
    tpu.vector_store %arg9[%c0_48, %c0_49, %c0_50], %153 {strides = array<i32>} : memref<1x8x8xf32, #tpu.memory_space<vmem>>, vector<1x8x8xf32>,
    return
  }
  func.func @transform_0(%arg0: i32) -> (i32, i32) {
    %c0_i32 = arith.constant 0 : i32
    %c0_i32_0 = arith.constant 0 : i32
    return %arg0, %c0_i32 : i32, i32
  }
  func.func @transform_1(%arg0: i32) -> (i32, i32) {
    %c0_i32 = arith.constant 0 : i32
    %c0_i32_0 = arith.constant 0 : i32
    return %arg0, %c0_i32 : i32, i32
  }
  func.func @transform_2(%arg0: i32) -> (i32, i32) {
    %c0_i32 = arith.constant 0 : i32
    %c0_i32_0 = arith.constant 0 : i32
    return %arg0, %c0_i32 : i32, i32
  }
  func.func @transform_3(%arg0: i32) -> (i32, i32) {
    %c0_i32 = arith.constant 0 : i32
    %c0_i32_0 = arith.constant 0 : i32
    %c0_i32_1 = arith.constant 0 : i32
    return %c0_i32, %c0_i32_0 : i32, i32
  }
  func.func @transform_4(%arg0: i32) -> (i32, i32) {
    %c0_i32 = arith.constant 0 : i32
    %c0_i32_0 = arith.constant 0 : i32
    %c0_i32_1 = arith.constant 0 : i32
    return %c0_i32, %c0_i32_0 : i32, i32
  }
  func.func @transform_5(%arg0: i32) -> (i32, i32) {
    %c0_i32 = arith.constant 0 : i32
    %c0_i32_0 = arith.constant 0 : i32
    %c0_i32_1 = arith.constant 0 : i32
    return %c0_i32, %c0_i32_0 : i32, i32
  }
  func.func @transform_6(%arg0: i32) -> (i32, i32) {
    %c0_i32 = arith.constant 0 : i32
    %c0_i32_0 = arith.constant 0 : i32
    %c0_i32_1 = arith.constant 0 : i32
    return %c0_i32, %c0_i32_0 : i32, i32
  }
  func.func @transform_7(%arg0: i32) -> (i32, i32) {
    %c0_i32 = arith.constant 0 : i32
    %c0_i32_0 = arith.constant 0 : i32
    return %arg0, %c0_i32 : i32, i32
  }
  func.func @transform_8(%arg0: i32) -> (i32, i32, i32) {
    %c0_i32 = arith.constant 0 : i32
    %c0_i32_0 = arith.constant 0 : i32
    %c0_i32_1 = arith.constant 0 : i32
    return %arg0, %c0_i32, %c0_i32_0 : i32, i32, i32
  }
}

</mosaic_0001>

<bundles_post_ra>
// kernel: guided_attention.1
= control target key start
LH: loop header
LB: loop body
LE: loop exit
PB: predicated region body
PF: predicated region fallthrough
CT: control target
= control target key end

     0   :  { %s1971_s0 = inlined_call_operand.vmem [shape: f32[16,64], index: 0, kind: input, shape index: {}]   ;;  %s1972_s1 = inlined_call_operand.vmem [shape: f32[16,64], index: 1, kind: input, shape index: {}]   ;;  %s1973_s2 = inlined_call_operand.vmem [shape: f32[16,64], index: 2, kind: input, shape index: {}]   ;;  %s1974_s3 = inlined_call_operand.vmem [shape: f32[256,64], index: 3, kind: input, shape index: {}]   ;;  %s1975_s4 = inlined_call_operand.vmem [shape: f32[64,128], index: 4, kind: input, shape index: {}]   ;;  %s1976_s5 = inlined_call_operand.vmem [shape: f32[10,64], index: 5, kind: input, shape index: {}]   ;;  %s1977_s6 = inlined_call_operand.vmem [shape: f32[64,64], index: 6, kind: input, shape index: {}]   ;;  %s1978_s7 = inlined_call_operand.hbm [shape: f32[16,64], index: 7, kind: output, shape index: {0}]   ;;  %s1979_s8 = inlined_call_operand.hbm [shape: f32[2,8,8], index: 8, kind: output, shape index: {1}]  }
   0x1   :  { %1982 = sst [smem:[#allocation8_spill]] %s1971_s0 }
   0x2   :  { %14 = vsyncpa [#allocation3], 0 }
   0x3   :  { %16 = vsyncpa [#allocation3 + $0x1], 0 }
   0x4   :  { %17 = vsyncpa [#allocation5], 0 }
   0x5   :  { %19 = vsyncpa [#allocation5 + $0x1], 0  ;;  %s1560_s27 = smov 0   ;;  %s1562_s28 = smov 0  }
   0x6   :  { %s1564_s29 = smov 0   ;;  %s1566_s30 = smov 0  }
   0x7 LB: > { %s1581_s9 = sadd.s32 4294967295, %s1508_s30   ;;  %s1180_s10 = sadd.s32 4294967294, %s1508_s30   ;;  %s1508_s30 = sphi %s1566_s30, %s1991_s30   ;;  %s1504_s29 = sphi %s1564_s29, %s1990_s29   ;;  %s1500_s28 = sphi %s1562_s28, %s1989_s28   ;;  %s1496_s27 = sphi %s1560_s27, %s1988_s27  }
   0x8   : > { %s1585_s11 = sadd.s32 1, %s1508_s30   ;;  %s194_s12 = sadd.s32 1, %s1504_s29 }
   0x9   : > { %s191_s13 = ssub.s32 %s1508_s30, %s1585_s11  ;;  %p204_p0 = scmp.ne.s32.totalorder %s1504_s29, %s1500_s28 }
   0xa   : > { %p192_p1 = scmp.eq.s32.totalorder %s191_s13, 0  ;;  %p205_p2 = scmp.eq.s32.totalorder %s1581_s9, 1 }
   0xb   : > { %p210_p3 = scmp.ne.s32.totalorder %s1500_s28, %s1496_s27  ;;  %p211_p4 = scmp.eq.s32.totalorder %s1180_s10, 1 }
   0xc   : > { %s1596_s14 = scalar_select %p192_p1, %s1504_s29, %s194_s12  }
   0xd   : > { %p1598_p5 = por %p205_p2, %p204_p0  ;;  %p1602_p6 = por %p211_p4, %p210_p3 }
   0xe   : > { %p1183_p7 = scmp.ge.s32.totalorder %s1508_s30, 1  ;;  %p288_p8 = scmp.lt.s32.totalorder %s1508_s30, 3 }
  0x10   : > { %p289_p9 = pnand %p1183_p7, %p288_p8 }
  0x11   : > { %p334_p10 = scmp.lt.s32.totalorder (!%p289_p9), %s1581_s9, 1  ;;  %s1985_s0 = sld [smem:[#allocation8_spill]] (!%p289_p9) }
  0x12   : > { %292 = sbr.rel (%p289_p9) target bundleno = 2214 (0x8a6), region = 48  ;;  %s1512_s17 = smov (!%p289_p9), 64  }
  0x17   : > { %v355_v0 = vld [vmem:[%s1974_s3 + $0x30] sm:$0xff]  ;;  %v356_v1 = vld [vmem:[%s1974_s3 + $0x38] sm:$0xff]  ;;  %v1510_v3 = vmov 0.0   ;;  %v353_v6 = vld [vmem:[%s1974_s3 + $0x20] sm:$0xff]  ;;  %vm1511_vm0 = vmmov 0   ;;  %s335_s20 = scalar_select %p334_p10, %s1581_s9, 1 }
  0x18   : > { %v417_v2 = vld [vmem:[%s1975_s4 + $0x30] sm:$0xff]  ;;  %1253 = vmatprep.subr.bf16.mxu0 %v1510_v3  ;;  %1265 = vmatprep.subr.bf16.mxu1 %v1510_v3  ;;  %v361_v4 = vpack.c.bf16 %v356_v1, %v355_v0  ;;  %v418_v5 = vld [vmem:[%s1975_s4 + $0x38] sm:$0xff]  ;;  %v354_v7 = vld [vmem:[%s1974_s3 + $0x28] sm:$0xff]  ;;  %vm367_vm1 = vcmask 523264   ;;  %vm592_vm2 = vcmask 64512   ;;  %vm701_vm3 = vcmask 1043456  }
  0x19   : > { %v423_v8 = vpack.c.bf16 %v418_v5, %v417_v2  ;;  %v415_v9 = vld [vmem:[%s1975_s4 + $0x20] sm:$0xff]  ;;  %v416_v10 = vld [vmem:[%s1975_s4 + $0x28] sm:$0xff]  ;;  %1261 = vmatprep.mubr.msk.bf16.mxu0 %vm1511_vm0, %v1510_v3  ;;  %1273 = vmatprep.mubr.msk.bf16.mxu1 %vm1511_vm0, %v1510_v3  ;;  %v360_v11 = vpack.c.bf16 %v354_v7, %v353_v6  ;;  %v351_v13 = vld [vmem:[%s1974_s3 + $0x10] sm:$0xff]  ;;  %s1656_s13 = sshll.u32 %s335_s20, 3 }
  0x1a   : > { %1254 = vmatpush3.bf16.msra.mxu0 %v361_v4  ;;  %v422_v12 = vpack.c.bf16 %v416_v10, %v415_v9  ;;  %v352_v14 = vld [vmem:[%s1974_s3 + $0x18] sm:$0xff]  ;;  %v413_v15 = vld [vmem:[%s1975_s4 + $0x10] sm:$0xff]  ;;  %v349_v19 = vld [vmem:[%s1974_s3] sm:$0xff]  ;;  %s337_s20 = scalar_lea.vmem %s1985_s0, %s1656_s13  ;;  %s341_s18 = scalar_lea.vmem %s1972_s1, %s1656_s13 }
  0x1b   : > { %1266 = vmatpush3.bf16.msra.mxu1 %v423_v8  ;;  %1255 = vmatprep.subr.bf16.mxu0 %v1510_v3  ;;  %v414_v16 = vld [vmem:[%s1975_s4 + $0x18] sm:$0xff]  ;;  %v359_v17 = vpack.c.bf16 %v352_v14, %v351_v13  ;;  %v350_v20 = vld [vmem:[%s1974_s3 + $0x8] sm:$0xff]  ;;  %v411_v21 = vld [vmem:[%s1975_s4] sm:$0xff]  ;;  %s345_s22 = scalar_lea.vmem %s1973_s2, %s1656_s13  ;;  %s1981_s13 = sshll.u32 %s1581_s9, 7 }
  0x1c   : > { %1267 = vmatprep.subr.bf16.mxu1 %v1510_v3  ;;  %v421_v18 = vpack.c.bf16 %v414_v16, %v413_v15  ;;  %v412_v22 = vld [vmem:[%s1975_s4 + $0x8] sm:$0xff]  ;;  %v358_v23 = vpack.c.bf16 %v350_v20, %v349_v19  ;;  %v347_v24 = vld [vmem:[%s337_s20] sm:$0xff]  ;;  %v1708_v41 = vld [vmem:[%s1977_s6 + $0x10] sm:$0xff]  ;;  %s1063_s26 = scalar_lea.hbm %s1979_s8, %s1981_s13 }
  0x1d   : > { %v420_v25 = vpack.c.bf16 %v412_v22, %v411_v21  ;;  %v348_v26 = vld [vmem:[%s341_s18] sm:$0xff]  ;;  %v357_v27 = vpack.c.bf16 %v347_v24, %v347_v24  ;;  %v1698_v33 = vld [vmem:[%s1977_s6 + $0x8] sm:$0xff]  ;;  %v1713_v42 = vld [vmem:[%s1977_s6 + $0x18] sm:$0xff]  ;;  %s1776_s18 = sand.u32 1, %s1500_s28  }
  0x1e   : > { %1256 = vmatpush3.bf16.msra.mxu0 %v360_v11  ;;  %v419_v28 = vpack.c.bf16 %v348_v26, %v348_v26  ;;  %v1189_v29 = vld [vmem:[%s1976_s5] ss:$0 sm:$0xff]  ;;  %v1192_v30 = vld [vmem:[%s1976_s5 + $0x1] ss:$0 sm:$0xff]  ;;  %v1727_v52 = vld [vmem:[%s1977_s6 + $0x28] sm:$0xff]  ;;  %s1980_s19 = sshll.u32 %s1776_s18, 3 }
  0x1f   : > { %1268 = vmatpush3.bf16.msra.mxu1 %v422_v12  ;;  %1257 = vmatprep.subr.bf16.mxu0 %v1510_v3  ;;  %v1693_v32 = vld [vmem:[%s1977_s6] sm:$0xff]  ;;  %v1736_v58 = vld [vmem:[%s1977_s6 + $0x30] sm:$0xff]  ;;  %v1741_v59 = vld [vmem:[%s1977_s6 + $0x38] sm:$0xff]  ;;  %s1785_s21 = scalar_lea.vmem [#allocation4], %s1980_s19  ;;  %s1039_s12 = scalar_lea.sflag [#allocation5], %s1776_s18 }
  0x20   : > { %1269 = vmatprep.subr.bf16.mxu1 %v1510_v3  ;;  %v1722_v51 = vld [vmem:[%s1977_s6 + $0x20] sm:$0xff]  ;;  %s1065_s10 = sshll.u32 %s1785_s21, 4  ;;  %s1066_s10 = int_to_ptr.vmem [resolvable:$true] %s1065_s10 }
  0x21   : > { %v1193_v24 = vld [vmem:[%s1976_s5 + $0x2] ss:$0 sm:$0xff] }
  0x22   : > { %1258 = vmatpush3.bf16.msra.mxu0 %v359_v17 }
  0x23   : > { %1270 = vmatpush3.bf16.msra.mxu1 %v421_v18  ;;  %1259 = vmatprep.subr.bf16.mxu0 %v1510_v3 }
  0x24   : > { %1271 = vmatprep.subr.bf16.mxu1 %v1510_v3 }
  0x26   : > { %1260 = vmatpush3.bf16.msra.mxu0 %v358_v23 }
  0x27   : > { %1272 = vmatpush3.bf16.msra.mxu1 %v420_v25 }
  0x29   : > { %1262 = vmatmul.mubr.msk.bf16.vlgmr.msra.gmra.mxu0 %vm367_vm1, %v357_v27 }
  0x2a   : > { %1274 = vmatmul.mubr.msk.bf16.vlgmr.msra.gmra.mxu1 %vm367_vm1, %v419_v28 }
  0xe9   : > { %v405_v31 = vpop.f32.mrf.mxu0 }
  0xea   : > { %v406_v34 = vadd.f32 %v1189_v29, %v405_v31  ;;  %v1700_v35 = vpop.f32.mrf.mxu1 }
  0xeb   : > { %v472_v36 = vadd.f32 %v1192_v30, %v1700_v35  ;;  %v1263_v37 = vpop.f32.mrf.mxu0 }
  0xec   : > { %v1275_v38 = vpop.f32.mrf.mxu1  ;;  %v491_v39 = vmul.f32 %v1693_v32, %v406_v34  ;;  %v492_v40 = vmul.f32 %v1698_v33, %v406_v34  ;;  %v493_v49 = vmul.f32 %v1708_v41, %v406_v34  ;;  %v494_v50 = vmul.f32 %v1713_v42, %v406_v34 }
  0xed   : > { %v503_v43 = vpack.c.bf16 %v472_v36, %v472_v36  ;;  %v408_v44 = vpop.f32.mrf.mxu0  ;;  %v495_v54 = vmul.f32 %v1722_v51, %v406_v34  ;;  %v496_v55 = vmul.f32 %v1727_v52, %v406_v34  ;;  %v497_v60 = vmul.f32 %v1736_v58, %v406_v34 }
  0xee   : > { %v464_v45 = vpop.f32.mrf.mxu1  ;;  %v499_v46 = vpack.c.bf16 %v492_v40, %v491_v39  ;;  %v500_v56 = vpack.c.bf16 %v494_v50, %v493_v49  ;;  %v498_v61 = vmul.f32 %v1741_v59, %v406_v34 }
  0xef   : > { %1333 = vmatprep.subr.msk.bf16.mxu0 %vm367_vm1, %v503_v43  ;;  %v1264_v47 = vpop.f32.mrf.mxu0  ;;  %v517_v48 = vsel %vm367_vm1, %v503_v43, 0  ;;  %v501_v57 = vpack.c.bf16 %v496_v55, %v495_v54 }
  0xf0   : > { %v1276_v53 = vpop.f32.mrf.mxu1  ;;  %1278 = vmatpush3.bf16.xpose.msra.mxu0 %v517_v48  ;;  %1279 = vmatprep.mubr.msk.bf16.mxu0 %vm367_vm1, %v499_v46  ;;  %v502_v62 = vpack.c.bf16 %v498_v61, %v497_v60 }
  0xf1   : > { %1297 = vmatprep.subr.bf16.mxu0 %v1510_v3 }
  0xf7   : > { %1280 = vmatmul.mubr.msk.bf16.vlgmr.msra.gmra.mxu0 %vm367_vm1, %v500_v56 }
  0xf8   : > { %1283 = vmatprep.mubr.msk.bf16.mxu0 %vm367_vm1, %v501_v57 }
  0xff   : > { %1284 = vmatmul.mubr.msk.bf16.gmra.mxu0 %vm367_vm1, %v502_v62 }
 0x100   : > { %1305 = vmatprep.mubr.msk.bf16.mxu0 %vm1511_vm0, %v1510_v3 }
 0x1b7   : > { %v1281_v63 = vpop.f32.mrf.mxu0 }
 0x1b8   : > { %v586_v0 = vmul.f32 0.35355338, %v1281_v63 }
 0x1b9   : > { %v553_v1 = vpop.f32.mrf.mxu0 }
 0x1ba   : > { %v584_v2 = vmul.f32 0.35355338, %v553_v1  ;;  %v599_v4 = vsel %vm592_vm2, %v586_v0, -inf }
 0x1bb   : > { %600 = vmax.xlane.f32.xlu1 %v599_v4  ;;  %v1282_v5 = vpop.f32.mrf.mxu0 }
 0x1bc   : > { %v587_v6 = vmul.f32 0.35355338, %v1282_v5  ;;  %v593_v7 = vsel %vm592_vm2, %v584_v2, -inf }
 0x1bd   : > { %594 = vmax.xlane.f32.xlu0 %v593_v7  ;;  %v556_v8 = vpop.f32.mrf.mxu0 }
 0x1be   : > { %v585_v9 = vmul.f32 0.35355338, %v556_v8  ;;  %v602_v10 = vsel %vm592_vm2, %v587_v6, -inf }
 0x1bf   : > { %603 = vmax.xlane.f32.xlu1 %v602_v10  ;;  %v1285_v11 = vpop.f32.mrf.mxu0 }
 0x1c0   : > { %v596_v12 = vsel %vm592_vm2, %v585_v9, -inf  ;;  %v590_v16 = vmul.f32 0.35355338, %v1285_v11 }
 0x1c1   : > { %597 = vmax.xlane.f32.xlu0 %v596_v12  ;;  %v569_v13 = vpop.f32.mrf.mxu0 }
 0x1c2   : > { %v588_v14 = vmul.f32 0.35355338, %v569_v13  ;;  %v611_v21 = vsel %vm592_vm2, %v590_v16, -inf }
 0x1c3   : > { %v1286_v15 = vpop.f32.mrf.mxu0 }
 0x1c4   : > { %v605_v17 = vsel %vm592_vm2, %v588_v14, -inf  ;;  %v591_v20 = vmul.f32 0.35355338, %v1286_v15 }
 0x1c5   : > { %606 = vmax.xlane.f32.xlu0 %v605_v17  ;;  %v572_v18 = vpop.f32.mrf.mxu0 }
 0x1c6   : > { %v589_v19 = vmul.f32 0.35355338, %v572_v18  ;;  %v614_v23 = vsel %vm592_vm2, %v591_v20, -inf }
 0x1c8   : > { %v608_v22 = vsel %vm592_vm2, %v589_v19, -inf }
 0x1c9   : > { %612 = vmax.xlane.f32.xlu0 %v611_v21  ;;  %609 = vmax.xlane.f32.xlu1 %v608_v22 }
 0x1cd   : > { %615 = vmax.xlane.f32.xlu1 %v614_v23 }
 0x1df   : > { %479 = vrot.lane.b32.xlu0 %v1193_v24, %s1512_s17 }
 0x244   : > { %v601_v25 = vpop.xlane.xlu1 %600 }
 0x245   : > { %v619_v26 = vsub.f32 %v586_v0, %v601_v25 }
 0x246   : > { %v595_v27 = vpop.xlane.xlu0 %594 }
 0x247   : > { %v629_v28 = vmul.f32 1.442695, %v619_v26  ;;  %v617_v29 = vsub.f32 %v584_v2, %v595_v27 }
 0x248   : > { %v604_v30 = vpop.xlane.xlu1 %603 }
 0x249   : > { %1382 = vpow2.f32 %v629_v28  ;;  %v625_v31 = vmul.f32 1.442695, %v617_v29  ;;  %v620_v34 = vsub.f32 %v587_v6, %v604_v30 }
 0x24a   : > { %v598_v36 = vpop.xlane.xlu0 %597 }
 0x24b   : > { %1384 = vpow2.f32 %v625_v31  ;;  %v631_v37 = vmul.f32 1.442695, %v620_v34  ;;  %v618_v38 = vsub.f32 %v585_v9, %v598_v36 }
 0x24d   : > { %1386 = vpow2.f32 %v631_v37  ;;  %v627_v40 = vmul.f32 1.442695, %v618_v38 }
 0x24e   : > { %v607_v39 = vpop.xlane.xlu0 %606 }
 0x24f   : > { %v621_v43 = vsub.f32 %v588_v14, %v607_v39  ;;  %1388 = vpow2.f32 %v627_v40 }
 0x251   : > { %v633_v44 = vmul.f32 1.442695, %v621_v43 }
 0x252   : > { %v613_v45 = vpop.xlane.xlu0 %612  ;;  %v610_v46 = vpop.xlane.xlu1 %609 }
 0x253   : > { %v623_v47 = vsub.f32 %v590_v16, %v613_v45  ;;  %1390 = vpow2.f32 %v633_v44  ;;  %v622_v53 = vsub.f32 %v589_v19, %v610_v46 }
 0x255   : > { %v637_v48 = vmul.f32 1.442695, %v623_v47  ;;  %v635_v60 = vmul.f32 1.442695, %v622_v53 }
 0x256   : > { %v1383_v49 = vpop.eup %1382  ;;  %v616_v50 = vpop.xlane.xlu1 %615 }
 0x257   : > { %1392 = vpow2.f32 %v637_v48  ;;  %v624_v54 = vsub.f32 %v591_v20, %v616_v50  ;;  %v647_v55 = vsel %vm592_vm2, %v1383_v49, 0.0  ;;  %v480_v11 = vpop.permute.xlu0 %479 }
 0x258   : > { %v1385_v56 = vpop.eup %1384  ;;  %648 = vadd.xlane.f32.xlu1 %v647_v55  ;;  %v482_v12 = vadd.f32 %v480_v11, %v1700_v35 }
 0x259   : > { %v639_v57 = vmul.f32 1.442695, %v624_v54  ;;  %v641_v61 = vsel %vm592_vm2, %v1385_v56, 0.0 }
 0x25a   : > { %v1387_v62 = vpop.eup %1386  ;;  %v685_v13 = vpack.c.bf16 %v482_v12, %v482_v12 }
 0x25b   : > { %1394 = vpow2.f32 %v639_v57  ;;  %v650_v63 = vsel %vm592_vm2, %v1387_v62, 0.0 }
 0x25c   : > { %642 = vadd.xlane.f32.xlu1 %v641_v61  ;;  %1396 = vpow2.f32 %v635_v60  ;;  %v1389_v0 = vpop.eup %1388  ;;  %v791_v60 = vld [vmem:[%s1974_s3 + $0x70] sm:$0xff]  ;;  %v792_v61 = vld [vmem:[%s1974_s3 + $0x78] sm:$0xff] }
 0x25d   : > { %v644_v2 = vsel %vm592_vm2, %v1389_v0, 0.0 }
 0x260   : > { %651 = vadd.xlane.f32.xlu1 %v650_v63  ;;  %v1391_v1 = vpop.eup %1390  ;;  %v789_v63 = vld [vmem:[%s1974_s3 + $0x60] sm:$0xff] }
 0x261   : > { %v653_v6 = vsel %vm592_vm2, %v1391_v1, 0.0 }
 0x264   : > { %v1393_v4 = vpop.eup %1392  ;;  %645 = vadd.xlane.f32.xlu1 %v644_v2  ;;  %v787_v2 = vld [vmem:[%s1974_s3 + $0x50] sm:$0xff] }
 0x265   : > { %v659_v5 = vsel %vm592_vm2, %v1393_v4, 0.0 }
 0x266   : > { %660 = vadd.xlane.f32.xlu0 %v659_v5 }
 0x268   : > { %v1395_v7 = vpop.eup %1394  ;;  %654 = vadd.xlane.f32.xlu1 %v653_v6  ;;  %v785_v6 = vld [vmem:[%s1974_s3 + $0x40] sm:$0xff] }
 0x269   : > { %v662_v8 = vsel %vm592_vm2, %v1395_v7, 0.0  ;;  %v1397_v9 = vpop.eup %1396 }
 0x26a   : > { %v656_v10 = vsel %vm592_vm2, %v1397_v9, 0.0 }
 0x26c   : > { %663 = vadd.xlane.f32.xlu1 %v662_v8 }
 0x270   : > { %657 = vadd.xlane.f32.xlu1 %v656_v10 }
 0x281   : > { %687 = vrot.lane.b32.xlu1 %v685_v13, %s1512_s17  ;;  %s1418_s17 = scalar_lea.vmem %s1066_s10, 128 }
 0x282   : > { %p1419_p11 = scmp.ne.s32.totalorder %s1066_s10, %s1418_s17 }
 0x284   : > { %p1420_p12 = pnand %p1419_p11, %p1598_p5 }
 0x286   : > { %p1421_p13 = pneg %p1420_p12 }
 0x2e1   : > { %v649_v14 = vpop.xlane.xlu1 %648 }
 0x2e5   : > { %v643_v15 = vpop.xlane.xlu1 %642 }
 0x2e6   : > { %1398 = vrcp.f32 %v643_v15 }
 0x2e9   : > { %v652_v16 = vpop.xlane.xlu1 %651 }
 0x2ea   : > { %1400 = vrcp.f32 %v652_v16 }
 0x2eb   : > { %1402 = vrcp.f32 %v649_v14 }
 0x2ed   : > { %v646_v17 = vpop.xlane.xlu1 %645 }
 0x2ee   : > { %1404 = vrcp.f32 %v646_v17 }
 0x2ef   : > { %v661_v20 = vpop.xlane.xlu0 %660 }
 0x2f1   : > { %v655_v18 = vpop.xlane.xlu1 %654 }
 0x2f2   : > { %1406 = vrcp.f32 %v655_v18 }
 0x2f3   : > { %v1399_v21 = vpop.eup %1398 }
 0x2f4   : > { %v666_v25 = vmul.f32 %v1399_v21, %v1385_v56 }
 0x2f5   : > { %v664_v19 = vpop.xlane.xlu1 %663 }
 0x2f6   : > { %1408 = vrcp.f32 %v664_v19 }
 0x2f7   : > { %v1401_v22 = vpop.eup %1400  ;;  %1410 = vrcp.f32 %v661_v20 }
 0x2f8   : > { %v1403_v23 = vpop.eup %1402  ;;  %v672_v27 = vmul.f32 %v1401_v22, %v1387_v62  ;;  %v797_v62 = vpack.c.bf16 %v792_v61, %v791_v60  ;;  %v943_v60 = vld [vmem:[%s1974_s3 + $0xf8] sm:$0xff]  ;;  %v940_v61 = vld [vmem:[%s1974_s3 + $0xe0] sm:$0xff] }
 0x2f9   : > { %v658_v35 = vpop.xlane.xlu1 %657  ;;  %v670_v29 = vmul.f32 %v1403_v23, %v1383_v49 }
 0x2fa   : > { %1412 = vrcp.f32 %v658_v35  ;;  %1298 = vmatpush3.bf16.msra.mxu0 %v797_v62 }
 0x2fb   : > { %v1405_v24 = vpop.eup %1404  ;;  %v682_v37 = vpack.c.bf16 %v672_v27, %v670_v29  ;;  %1299 = vmatprep.subr.bf16.mxu0 %v1510_v3 }
 0x2fc   : > { %v668_v26 = vmul.f32 %v1405_v24, %v1389_v0  ;;  %v790_v0 = vld [vmem:[%s1974_s3 + $0x68] sm:$0xff] }
 0x2fd   : > { %v688_v28 = vpop.permute.xlu1 %687 }
 0x2fe   : > { %v703_v30 = vsel %vm701_vm3, %v688_v28, 0  ;;  %1334 = vmatprep.subr.msk.bf16.mxu1 %vm701_vm3, %v688_v28  ;;  %v681_v31 = vpack.c.bf16 %v668_v26, %v666_v25  ;;  %v1024_v34 = vadd.f32 %v668_v26, %v666_v25 }
 0x2ff   : > { %1288 = vmatpush3.bf16.msra.mxu1 %v703_v30  ;;  %v1407_v38 = vpop.eup %1406 }
 0x300   : > { %1289 = vmatprep.mubr.msk.bf16.mxu1 %vm592_vm2, %v681_v31  ;;  %v1025_v36 = vadd.f32 %v1024_v34, %v670_v29  ;;  %1309 = vmatprep.subr.bf16.mxu1 %v1510_v3  ;;  %v674_v44 = vmul.f32 %v1407_v38, %v1391_v1  ;;  %v796_v1 = vpack.c.bf16 %v790_v0, %v789_v63  ;;  %v941_v63 = vld [vmem:[%s1974_s3 + $0xe8] sm:$0xff] }
 0x301   : > { %v947_v0 = vpack.c.bf16 %v941_v63, %v940_v61 }
 0x302   : > { %1290 = vmatmul.mubr.msk.bf16.vlgmr.msra.gmra.mxu1 %vm592_vm2, %v682_v37  ;;  %v1026_v40 = vadd.f32 %v1025_v36, %v672_v27  ;;  %1300 = vmatpush3.bf16.msra.mxu0 %v796_v1 }
 0x303   : > { %v1409_v39 = vpop.eup %1408  ;;  %1301 = vmatprep.subr.bf16.mxu0 %v1510_v3 }
 0x304   : > { %v1411_v43 = vpop.eup %1410  ;;  %v680_v46 = vmul.f32 %v1409_v39, %v1395_v7  ;;  %v1027_v48 = vadd.f32 %v1026_v40, %v674_v44  ;;  %v786_v7 = vld [vmem:[%s1974_s3 + $0x48] sm:$0xff] }
 0x305   : > { %v678_v49 = vmul.f32 %v1411_v43, %v1393_v4  ;;  %v788_v4 = vld [vmem:[%s1974_s3 + $0x58] sm:$0xff]  ;;  %v794_v8 = vpack.c.bf16 %v786_v7, %v785_v6  ;;  %v880_v43 = vld [vmem:[%s1974_s3 + $0xb0] sm:$0xff]  ;;  %v1204_v6 = vld [vmem:[%s1976_s5 + $0x4] ss:$0 sm:$0xff] }
 0x306   : > { %v795_v5 = vpack.c.bf16 %v788_v4, %v787_v2 }
 0x307   : > { %v1413_v45 = vpop.eup %1412  ;;  %v684_v54 = vpack.c.bf16 %v680_v46, %v678_v49 }
 0x308   : > { %v676_v47 = vmul.f32 %v1413_v45, %v1397_v9  ;;  %1302 = vmatpush3.bf16.msra.mxu0 %v795_v5 }
 0x309   : > { %1303 = vmatprep.subr.bf16.mxu0 %v1510_v3 }
 0x30a   : > { %v683_v50 = vpack.c.bf16 %v676_v47, %v674_v44  ;;  %v1028_v53 = vadd.f32 %v1027_v48, %v676_v47  ;;  %v881_v44 = vld [vmem:[%s1974_s3 + $0xb8] sm:$0xff]  ;;  %v879_v47 = vld [vmem:[%s1974_s3 + $0xa8] sm:$0xff] }
 0x30b   : > { %v886_v45 = vpack.c.bf16 %v881_v44, %v880_v43 }
 0x30c   : > { %1293 = vmatprep.mubr.msk.bf16.mxu1 %vm592_vm2, %v683_v50  ;;  %v1029_v55 = vadd.f32 %v1028_v53, %v678_v49  ;;  %1304 = vmatpush3.bf16.msra.mxu0 %v794_v8  ;;  %v876_v49 = vld [vmem:[%s1974_s3 + $0x90] sm:$0xff]  ;;  %v877_v50 = vld [vmem:[%s1974_s3 + $0x98] sm:$0xff]  ;;  %v1205_v8 = vld [vmem:[%s1976_s5 + $0x5] ss:$0 sm:$0xff] }
 0x30d   : > { %1294 = vmatmul.mubr.msk.bf16.gmra.mxu1 %vm592_vm2, %v684_v54  ;;  %1321 = vmatprep.subr.bf16.mxu0 %v1510_v3  ;;  %v884_v53 = vpack.c.bf16 %v877_v50, %v876_v49  ;;  %v874_v54 = vld [vmem:[%s1974_s3 + $0x80] sm:$0xff] }
 0x30e   : > { %1317 = vmatprep.mubr.msk.bf16.mxu1 %vm1511_vm0, %v1510_v3  ;;  %v1030_v56 = vadd.f32 %v1029_v55, %v680_v46  ;;  %1310 = vmatpush3.bf16.msra.mxu1 %v886_v45  ;;  %v878_v46 = vld [vmem:[%s1974_s3 + $0xa0] sm:$0xff]  ;;  %v875_v55 = vld [vmem:[%s1974_s3 + $0x88] sm:$0xff] }
 0x30f   : > { %1311 = vmatprep.subr.bf16.mxu1 %v1510_v3  ;;  %v885_v48 = vpack.c.bf16 %v879_v47, %v878_v46 }
 0x310   : > { %v1031_v57 = vmul.f32 0.125, %v1030_v56  ;;  %v883_v56 = vpack.c.bf16 %v875_v55, %v874_v54 }
 0x312   : > { %1032 = vst.msk [vmem:[%s1785_s21] sm:$0xff] %vm592_vm2, %v1031_v57  ;;  %1312 = vmatpush3.bf16.msra.mxu1 %v885_v48  ;;  %v942_v57 = vld [vmem:[%s1974_s3 + $0xf0] sm:$0xff] }
 0x313   : > { %1313 = vmatprep.subr.bf16.mxu1 %v1510_v3  ;;  %v948_v62 = vpack.c.bf16 %v943_v60, %v942_v57 }
 0x316   : > { %1314 = vmatpush3.bf16.msra.mxu1 %v884_v53 }
 0x317   : > { %1315 = vmatprep.subr.bf16.mxu1 %v1510_v3 }
 0x31a   : > { %1316 = vmatpush3.bf16.msra.mxu1 %v883_v56 }
 0x3c2   : > { %v1291_v9 = vpop.f32.mrf.mxu1 }
 0x3c3   : > { %v772_v15 = vmul.f32 %v1291_v9, %v1708_v41 }
 0x3c4   : > { %v739_v10 = vpop.f32.mrf.mxu1 }
 0x3c5   : > { %v770_v13 = vmul.f32 %v739_v10, %v1693_v32 }
 0x3c6   : > { %v1292_v11 = vpop.f32.mrf.mxu1 }
 0x3c7   : > { %v773_v19 = vmul.f32 %v1292_v11, %v1713_v42  ;;  %v1202_v42 = vld [vmem:[%s1976_s5 + $0x3] ss:$0 sm:$0xff] }
 0x3c8   : > { %v742_v12 = vpop.f32.mrf.mxu1 }
 0x3c9   : > { %v771_v14 = vmul.f32 %v742_v12, %v1698_v33  ;;  %v938_v12 = vld [vmem:[%s1974_s3 + $0xd0] sm:$0xff] }
 0x3cb   : > { %v778_v16 = vadd.f32 %v771_v14, %v770_v13  ;;  %v939_v13 = vld [vmem:[%s1974_s3 + $0xd8] sm:$0xff] }
 0x3cc   : > { %v946_v14 = vpack.c.bf16 %v939_v13, %v938_v12 }
 0x3cd   : > { %v779_v17 = vadd.f32 %v778_v16, %v772_v15  ;;  %v1295_v18 = vpop.f32.mrf.mxu1  ;;  %v936_v15 = vld [vmem:[%s1974_s3 + $0xc0] sm:$0xff]  ;;  %v937_v16 = vld [vmem:[%s1974_s3 + $0xc8] sm:$0xff] }
 0x3ce   : > { %v776_v32 = vmul.f32 %v1295_v18, %v1736_v58  ;;  %v1206_v18 = vld [vmem:[%s1976_s5 + $0x6] ss:$0 sm:$0xff] }
 0x3cf   : > { %v755_v20 = vpop.f32.mrf.mxu1  ;;  %v780_v22 = vadd.f32 %v779_v17, %v773_v19  ;;  %v945_v17 = vpack.c.bf16 %v937_v16, %v936_v15 }
 0x3d0   : > { %v774_v21 = vmul.f32 %v755_v20, %v1722_v51 }
 0x3d1   : > { %v1296_v35 = vpop.f32.mrf.mxu1 }
 0x3d2   : > { %v781_v24 = vadd.f32 %v780_v22, %v774_v21  ;;  %v777_v41 = vmul.f32 %v1296_v35, %v1741_v59 }
 0x3d3   : > { %v758_v23 = vpop.f32.mrf.mxu1 }
 0x3d4   : > { %v775_v25 = vmul.f32 %v758_v23, %v1727_v52  ;;  %v846_v52 = vld [vmem:[%s345_s22] sm:$0xff]  ;;  %s1513_s22 = smov [#allocation4]  }
 0x3d5   : > { %s1422_s23 = sshll.u32 %s1513_s22, 4  ;;  %s1423_s23 = int_to_ptr.vmem [resolvable:$false] %s1422_s23 }
 0x3d6   : > { %v782_v33 = vadd.f32 %v781_v24, %v775_v25  ;;  %v1208_v24 = vld [vmem:[%s1976_s5 + $0x7] ss:$0 sm:$0xff]  ;;  %s1424_s20 = scalar_lea.vmem %s1423_s23, 256  ;;  %p1425_p0 = scmp.lt.s32.totalorder %s1066_s10, %s1423_s23 }
 0x3d7   : > { %p1426_p1 = scmp.lt.s32.totalorder %s1424_s20, %s1418_s17 }
 0x3d8   : > { %v783_v26 = vadd.f32 %v782_v33, %v776_v32 }
 0x3d9   : > { %p1427_p2 = por %p1426_p1, %p1425_p0 }
 0x3da   : > { %v784_v27 = vadd.f32 %v783_v26, %v777_v41 }
 0x3db   : > { %p1428_p3 = pnand %p1427_p2, %p1421_p13 }
 0x3dc   : > { %v793_v28 = vpack.c.bf16 %v784_v27, %v784_v27 }
 0x3de   : > { %1306 = vmatmul.mubr.msk.bf16.vlgmr.msra.gmra.mxu0 %vm367_vm1, %v793_v28 }
 0x3df   : > { %1329 = vmatprep.mubr.msk.bf16.mxu0 %vm1511_vm0, %v1510_v3  ;;  %1322 = vmatpush3.bf16.msra.mxu0 %v948_v62 }
 0x3e0   : > { %1323 = vmatprep.subr.bf16.mxu0 %v1510_v3 }
 0x3e3   : > { %1324 = vmatpush3.bf16.msra.mxu0 %v947_v0 }
 0x3e4   : > { %1325 = vmatprep.subr.bf16.mxu0 %v1510_v3 }
 0x3e7   : > { %1326 = vmatpush3.bf16.msra.mxu0 %v946_v14 }
 0x3e8   : > { %1327 = vmatprep.subr.bf16.mxu0 %v1510_v3 }
 0x3eb   : > { %1328 = vmatpush3.bf16.msra.mxu0 %v945_v17 }
 0x49e   : > { %v840_v51 = vpop.f32.mrf.mxu0 }
 0x49f   : > { %v841_v58 = vadd.f32 %v1202_v42, %v840_v51 }
 0x4a0   : > { %v1307_v59 = vpop.f32.mrf.mxu0 }
 0x4a1   : > { %v847_v29 = vadd.f32 %v846_v52, %v841_v58 }
 0x4a2   : > { %v843_v30 = vpop.f32.mrf.mxu0 }
 0x4a3   : > { %v850_v31 = vsel %vm367_vm1, %v847_v29, 0.0 }
 0x4a4   : > { %851 = vadd.xlane.f32.xlu1 %v850_v31  ;;  %v1308_v34 = vpop.f32.mrf.mxu0 }
 0x52d   : > { %v852_v36 = vpop.xlane.xlu1 %851 }
 0x52e   : > { %v854_v37 = vmul.f32 0.015625, %v852_v36 }
 0x530   : > { %v855_v38 = vsub.f32 %v847_v29, %v854_v37 }
 0x532   : > { %v856_v39 = vmul.f32 %v855_v38, %v855_v38 }
 0x534   : > { %v857_v40 = vsel %vm367_vm1, %v856_v39, 0.0 }
 0x535   : > { %858 = vadd.xlane.f32.xlu0 %v857_v40 }
 0x5be   : > { %v859_v1 = vpop.xlane.xlu0 %858 }
 0x5bf   : > { %v860_v2 = vmul.f32 0.015625, %v859_v1 }
 0x5c1   : > { %v861_v4 = vadd.f32 1e-05, %v860_v2 }
 0x5c3   : > { %1414 = vrsqrt.f32 %v861_v4 }
 0x5d0   : > { %v1415_v5 = vpop.eup %1414 }
 0x5d1   : > { %v863_v7 = vmul.f32 %v1415_v5, %v855_v38 }
 0x5d3   : > { %v868_v9 = vmul.f32 %v1204_v6, %v863_v7 }
 0x5d5   : > { %v873_v10 = vadd.f32 %v1205_v8, %v868_v9 }
 0x5d7   : > { %v882_v11 = vpack.c.bf16 %v873_v10, %v873_v10 }
 0x5d9   : > { %1318 = vmatmul.mubr.msk.bf16.vlgmr.msra.gmra.mxu1 %vm367_vm1, %v882_v11 }
 0x699   : > { %v929_v19 = vpop.f32.mrf.mxu1 }
 0x69a   : > { %v930_v20 = vadd.f32 %v1206_v18, %v929_v19 }
 0x69b   : > { %v1319_v21 = vpop.f32.mrf.mxu1 }
 0x69c   : > { %v935_v22 = vmax.f32 %v930_v20, 0.0 }
 0x69d   : > { %v932_v35 = vpop.f32.mrf.mxu1 }
 0x69e   : > { %v944_v3 = vpack.c.bf16 %v935_v22, %v935_v22 }
 0x69f   : > { %v1320_v23 = vpop.f32.mrf.mxu1 }
 0x6a0   : > { %1330 = vmatmul.mubr.msk.bf16.vlgmr.msra.gmra.mxu0 %vm367_vm1, %v944_v3 }
 0x760   : > { %v991_v25 = vpop.f32.mrf.mxu0 }
 0x761   : > { %v992_v32 = vadd.f32 %v1208_v24, %v991_v25 }
 0x762   : > { %v1331_v33 = vpop.f32.mrf.mxu0 }
 0x763   : > { %v997_v41 = vadd.f32 %v992_v32, %v873_v10 }
 0x764   : > { %v994_v26 = vpop.f32.mrf.mxu0 }
 0x765   : > { %v1000_v27 = vsel %vm367_vm1, %v997_v41, 0.0 }
 0x766   : > { %1001 = vadd.xlane.f32.xlu0 %v1000_v27  ;;  %v1332_v28 = vpop.f32.mrf.mxu0 }
 0x7ef   : > { %v1002_v42 = vpop.xlane.xlu0 %1001 }
 0x7f0   : > { %v1003_v51 = vmul.f32 0.015625, %v1002_v42 }
 0x7f2   : > { %v1004_v52 = vsub.f32 %v997_v41, %v1003_v51 }
 0x7f4   : > { %v1005_v58 = vmul.f32 %v1004_v52, %v1004_v52 }
 0x7f6   : > { %v1006_v59 = vsel %vm367_vm1, %v1005_v58, 0.0 }
 0x7f7   : > { %1007 = vadd.xlane.f32.xlu0 %v1006_v59 }
 0x7f8   : > { %1431 = shalt.err (!%p1428_p3)
}
 0x7f9   : > { %s1432_s19 = scalar_lea.hbm %s1063_s26, 128  ;;  %s1436_s25 = scalar_lea.hbm %s1979_s8, 256 }
 0x7fa   : > { %p1433_p4 = scmp.ne.s32.totalorder %s1063_s26, %s1432_s19  ;;  %p1437_p9 = scmp.lt.s32.totalorder %s1063_s26, %s1979_s8 }
 0x7fb   : > { %p1438_p10 = scmp.lt.s32.totalorder %s1436_s25, %s1432_s19 }
 0x7fc   : > { %p1434_p7 = pnand %p1433_p4, %p1598_p5 }
 0x7fd   : > { %p1439_p11 = por %p1438_p10, %p1437_p9 }
 0x7fe   : > { %p1435_p8 = pneg %p1434_p7 }
 0x800   : > { %p1440_p12 = pnand %p1439_p11, %p1435_p8 }
 0x802   : > { %1443 = shalt.err (!%p1440_p12)
}
 0x803   : > { %1336 = dma.vmem_to_hbm [thread:$0]  (%p1598_p5), %s1066_s10, 128, %s1063_s26, %s1039_s12   ;;  %v1210_v36 = vld [vmem:[%s1976_s5 + $0x8] ss:$0 sm:$0xff]  ;;  %v1211_v38 = vld [vmem:[%s1976_s5 + $0x9] ss:$0 sm:$0xff] }
 0x804   : > { %s1986_s13 = sshll.u32 %s1776_s18, 3  ;;  %s1987_s26 = sshll.u32 %s1581_s9, 7 }
 0x805   : > { %s326_s23 = scalar_lea.vmem [#allocation2], %s1986_s13  ;;  %s1050_s21 = scalar_lea.hbm %s1978_s7, %s1987_s26 }
 0x806   : > { %s1052_s20 = sshll.u32 %s326_s23, 4  ;;  %s1034_s24 = scalar_lea.sflag [#allocation3], %s1776_s18  ;;  %s1053_s20 = int_to_ptr.vmem [resolvable:$true] %s1052_s20 }
 0x807   : > { %s1444_s25 = scalar_lea.vmem %s1053_s20, 128  ;;  %s1514_s17 = smov [#allocation2]  }
 0x808   : > { %p1445_p13 = scmp.ne.s32.totalorder %s1053_s20, %s1444_s25  ;;  %s1448_s22 = sshll.u32 %s1514_s17, 4  ;;  %s1449_s22 = int_to_ptr.vmem [resolvable:$false] %s1448_s22 }
 0x809   : > { %s1450_s0 = scalar_lea.vmem %s1449_s22, 256  ;;  %p1451_p2 = scmp.lt.s32.totalorder %s1053_s20, %s1449_s22 }
 0x80a   : > { %p1446_p0 = pnand %p1445_p13, %p1598_p5  ;;  %p1452_p3 = scmp.lt.s32.totalorder %s1450_s0, %s1444_s25 }
 0x80c   : > { %p1447_p1 = pneg %p1446_p0  ;;  %p1453_p4 = por %p1452_p3, %p1451_p2 }
 0x80e   : > { %p1454_p7 = pnand %p1453_p4, %p1447_p1 }
 0x880   : > { %v1008_v29 = vpop.xlane.xlu0 %1007 }
 0x881   : > { %v1009_v30 = vmul.f32 0.015625, %v1008_v29 }
 0x883   : > { %v1010_v31 = vadd.f32 1e-05, %v1009_v30 }
 0x885   : > { %1416 = vrsqrt.f32 %v1010_v31 }
 0x892   : > { %v1417_v34 = vpop.eup %1416 }
 0x893   : > { %v1012_v37 = vmul.f32 %v1417_v34, %v1004_v52 }
 0x895   : > { %v1017_v39 = vmul.f32 %v1210_v36, %v1012_v37 }
 0x897   : > { %v1022_v40 = vadd.f32 %v1211_v38, %v1017_v39 }
 0x899   : > { %1023 = vst.msk [vmem:[%s326_s23] sm:$0xff] %vm367_vm1, %v1022_v40 }
 0x89a   : > { %1457 = shalt.err (!%p1454_p7)
}
 0x89b   : > { %s1458_s9 = scalar_lea.hbm %s1050_s21, 128  ;;  %s1462_s13 = scalar_lea.hbm %s1978_s7, 256 }
 0x89c   : > { %p1459_p8 = scmp.ne.s32.totalorder %s1050_s21, %s1458_s9  ;;  %p1463_p11 = scmp.lt.s32.totalorder %s1050_s21, %s1978_s7 }
 0x89d   : > { %p1464_p12 = scmp.lt.s32.totalorder %s1462_s13, %s1458_s9 }
 0x89e   : > { %p1460_p9 = pnand %p1459_p8, %p1598_p5 }
 0x89f   : > { %p1465_p13 = por %p1464_p12, %p1463_p11 }
 0x8a0   : > { %p1461_p10 = pneg %p1460_p9 }
 0x8a2   : > { %p1466_p0 = pnand %p1465_p13, %p1461_p10 }
 0x8a4   : > { %1469 = shalt.err (!%p1466_p0)
}
 0x8a5   : > { %1335 = dma.vmem_to_hbm [thread:$0]  (%p1598_p5), %s1053_s20, 128, %s1050_s21, %s1034_s24  }
 0x8a6 PF: > { %p1346_p1 = scmp.ge.s32.totalorder %s1508_s30, 2  ;;  %s1077_s10 = sand.u32 1, %s1496_s27  }
 0x8a7   : > { %s1078_s12 = scalar_lea.sflag [#allocation3], %s1077_s10 }
 0x8a8   : > { %p1340_p2 = pnand %p1346_p1, %p1602_p6 }
 0x8aa   : > { %p1341_p3 = pneg %p1340_p2 }
 0x8ac   : > { %1487 = dma.done.wait (%p1341_p3), %s1078_s12, 128  }
 0x8ad   : > { %1489 = vsyncadd (%p1341_p3), %s1078_s12, 4294967168  ;;  %s1087_s25 = scalar_lea.sflag [#allocation5], %s1077_s10 }
 0x8ae   : > { %1491 = dma.done.wait (%p1341_p3), %s1087_s25, 128  }
 0x8af   : > { %1493 = vsyncadd (%p1341_p3), %s1087_s25, 4294967168  ;;  %p22_p5 = scmp.ge.s32.totalorder %s1585_s11, 4   ;;  %s1988_s27 = smov %s1500_s28 }
 0x8b0   : > { %s1989_s28 = smov %s1504_s29  ;;  %s1990_s29 = smov %s1596_s14 }
 0x8b1   : > { %s1991_s30 = smov %s1585_s11  ;;  %24 = sbr.rel (!%p22_p5) target bundleno = 7 (0x7), region = 106 }
 0x8b6   :  { %1092 = vsyncpa [#allocation3], 1 }
 0x8b7   :  { %1094 = vsyncpa [#allocation3 + $0x1], 1 }
 0x8b8   :  { %1095 = vsyncpa [#allocation5], 1 }
 0x8b9   :  { %1097 = vsyncpa [#allocation5 + $0x1], 1 }

</bundles_post_ra>
